<compile_context>
chip_gen: v7x
topology: tpu7x:2x2x1
jax: 0.10.0
libtpu: 0.0.40
codegen_flags: <defaults>
</compile_context>

<pallas_src>
import jax
import jax.numpy as jnp
import numpy as np
from jax.experimental import pallas as pl
from jax.experimental.pallas import tpu as pltpu

_LANES = 128                        # lane width of a vreg
_SMALL_BYTES = 2 << 20              # <= 2 MiB: single-block fast path
_TARGET_BLOCK_BYTES = 3 << 20       # ~3 MiB/block: 4 buffers fit v5e's 16 MiB default
_VMEM_LIMIT_BYTES = 48 << 20        # headroom guard; < v7x 64 MiB physical VMEM


def _copy_kernel(x_ref, o_ref):
    # Pure pass-through: copy the current VMEM tile to the output tile.
    o_ref[...] = x_ref[...]


def _as_2d(x):
    """Free (bitcast-style) 2D view of a contiguous array — never pads."""
    total = x.size
    if total % _LANES == 0:
        return x.reshape(total // _LANES, _LANES)      # lane-dense view
    last = x.shape[-1] if x.ndim >= 1 else 1
    last = max(1, last)
    return x.reshape(total // last, last)              # natural trailing-dim view


def layer2_forward(x, *, in_place=False):
    """Pallas equivalent of Layer2.forward (identity pass-through).

    x: any array (e.g. NCHW). Returns x unchanged, streamed through a tiled
    Pallas VMEM copy.  Set in_place=True only when the caller donates x
    (jax.jit(..., donate_argnums=...)) so the alias actually elides the output
    HBM buffer.
    """
    orig_shape = x.shape
    total = x.size
    if total == 0:
        return x                                       # nothing to copy

    x2d = _as_2d(x)
    rows, cols = x2d.shape

    itemsize = jnp.dtype(x2d.dtype).itemsize
    sub_mult = 8 * max(1, 4 // itemsize)               # 8 f32, 16 bf16, 32 i8
    total_bytes = total * itemsize

    if total_bytes <= _SMALL_BYTES:
        # Fast path: one block equal to the full array dims (no (8,128)
        # divisibility needed) -> one DMA in, one DMA out.
        tr, tc = rows, cols
    else:
        row_bytes = cols * itemsize
        if row_bytes <= _TARGET_BLOCK_BYTES:
            # Tile rows only; keep the full trailing dim (lane-dense when the
            # lane-dense view was selected).
            tc = cols
            tr_budget = max(1, _TARGET_BLOCK_BYTES // row_bytes)
            tr = min(tr_budget, pl.cdiv(rows, 2))      # >=2 blocks for v7x 2xTC
            if tr >= rows:
                tr = rows                              # equals full dim: legal
            elif tr >= sub_mult:
                tr = (tr // sub_mult) * sub_mult       # keep native sublane tile
            else:
                tr = sub_mult                          # must be a multiple of 8
        else:
            # A single full row exceeds the block budget: tile the lane axis
            # too, in multiples of 128 lanes.
            tr = rows if rows <= sub_mult else sub_mult
            tc_budget = max(_LANES, _TARGET_BLOCK_BYTES // (tr * itemsize))
            tc = max(_LANES, (tc_budget // _LANES) * _LANES)
            tc = min(tc, max(_LANES, cols))

    grid = (pl.cdiv(rows, tr), pl.cdiv(cols, tc))

    out = pl.pallas_call(
        _copy_kernel,
        out_shape=jax.ShapeDtypeStruct((rows, cols), x2d.dtype),
        grid=grid,
        in_specs=[pl.BlockSpec((tr, tc), lambda i, j: (i, j))],
        out_specs=pl.BlockSpec((tr, tc), lambda i, j: (i, j)),
        input_output_aliases=({0: 0} if in_place else {}),
        compiler_params=pltpu.CompilerParams(
            dimension_semantics=("parallel", "parallel"),
            vmem_limit_bytes=_VMEM_LIMIT_BYTES,
        ),
        cost_estimate=pl.CostEstimate(
            flops=0, transcendentals=0, bytes_accessed=2 * total_bytes
        ),
    )(x2d)

    return out.reshape(orig_shape)


if __name__ == "__main__":
    key = jax.random.PRNGKey(0)
    # Small NCHW input consistent with a generic conv-style layer module.
    x = jax.random.normal(key, (2, 4, 16, 16), dtype=jnp.float32)
    x_host = np.asarray(x)  # host copy for verification after donation

    # Default path: out-of-place identity copy.
    fwd = jax.jit(layer2_forward)
    y = fwd(x)
    jax.block_until_ready(y)
    assert y.shape == x.shape
    assert jnp.array_equal(y, x)

    # In-place path: alias the output to the donated input so XLA can elide
    # the second HBM buffer (x must not be used afterwards).
    fwd_inplace = jax.jit(lambda a: layer2_forward(a, in_place=True),
                          donate_argnums=0)
    y2 = fwd_inplace(x)
    jax.block_until_ready(y2)
    assert y2.shape == x_host.shape
    assert np.array_equal(np.asarray(y2), x_host)

    print("KERNEL_OK")
</pallas_src>

<mosaic_0001>
module attributes {stable_mosaic.version = 11 : i64} {
  func.func @_copy_kernel(%arg0: i32, %arg1: i32, %arg2: memref<16x128xf32, #tpu.memory_space<vmem>>, %arg3: memref<16x128xf32, #tpu.memory_space<vmem>>) attributes {dimension_semantics = [#tpu.dimension_semantics<parallel>, #tpu.dimension_semantics<parallel>], iteration_bounds = array<i64: 1, 1>, scalar_prefetch = 0 : i64, scratch_operands = 0 : i64, tpu.core_type = #tpu.core_type<tc>, window_params = [{transform_indices = @transform_0, window_bounds = array<i64: 16, 128>}, {transform_indices = @transform_1, window_bounds = array<i64: 16, 128>}]} {
    %c0 = arith.constant 0 : index
    %c0_0 = arith.constant 0 : index
    %0 = vector.load %arg2[%c0, %c0_0] : memref<16x128xf32, #tpu.memory_space<vmem>>, vector<16x128xf32>
    %c0_1 = arith.constant 0 : index
    %c0_2 = arith.constant 0 : index
    %1 = vector.load %arg3[%c0_1, %c0_2] : memref<16x128xf32, #tpu.memory_space<vmem>>, vector<16x128xf32>
    tpu.vector_store %arg3[%c0_1, %c0_2], %0 {strides = array<i32>} : memref<16x128xf32, #tpu.memory_space<vmem>>, vector<16x128xf32>,
    return
  }
  func.func @transform_0(%arg0: i32, %arg1: i32) -> (i32, i32) {
    %c0_i32 = arith.constant 0 : i32
    return %arg0, %arg1 : i32, i32
  }
  func.func @transform_1(%arg0: i32, %arg1: i32) -> (i32, i32) {
    %c0_i32 = arith.constant 0 : i32
    return %arg0, %arg1 : i32, i32
  }
}

</mosaic_0001>

<bundles_post_ra>
// kernel: layer2_forward.1
= control target key start
LH: loop header
LB: loop body
LE: loop exit
PB: predicated region body
PF: predicated region fallthrough
CT: control target
= control target key end

     0   :  { %s38_s0 = inlined_call_operand.vmem [shape: f32[16,128], index: 0, kind: input, shape index: {}]   ;;  %s39_s1 = inlined_call_operand.vmem [shape: f32[16,128], index: 1, kind: output, shape index: {}]  }
   0x1   :  { %v8_v0 = vld [vmem:[%s38_s0] sm:$0xff]  ;;  %v9_v1 = vld [vmem:[%s38_s0 + $0x8] sm:$0xff] }
   0x2   :  { %10 = vst [vmem:[%s39_s1] sm:$0xff] %v8_v0  ;;  %11 = vst [vmem:[%s39_s1 + $0x8] sm:$0xff] %v9_v1 }

</bundles_post_ra>
